<compile_context>
chip_gen: v5e
topology: v5e:2x2
jax: 0.10.0
libtpu: 0.0.40
codegen_flags: <defaults>
</compile_context>

<pallas_src>
import functools

import jax
import jax.numpy as jnp
from jax.experimental import pallas as pl
from jax.experimental.pallas import tpu as pltpu

_LANE = 128
_SUB = 8
_TR_CAP = 8192      # rows per tile: 4 MiB per f32 input block
_ROW_CHUNK = 128    # rows reduced per inner-loop step (keeps reduce in-register)


def _cdiv(a, b):
    return -(-a // b)


def _round_up(x, m):
    return _cdiv(x, m) * m


def _mae_kernel(pred_ref, gt_ref, out_ref, *, n_rows, chunk):
    """Masked |pred - gt| partials for one (TR, 128) tile.

    Writes a packed (1, 8, 256) f32 block: lanes [0,128) = partial sum,
    lanes [128,256) = partial count.
    """
    i = pl.program_id(0)
    tr, lanes = pred_ref.shape          # Python ints
    n_chunks, rem = divmod(tr, chunk)   # both multiples of 8

    def chunk_partial(row0, rows, masked):
        # (rows, 128) chunk -> (8, 128) partial sum / count (VPU adds only).
        p = pred_ref[pl.ds(row0, rows), :].astype(jnp.float32)
        g = gt_ref[pl.ds(row0, rows), :].astype(jnp.float32)
        err = jnp.abs(p - g)
        valid = g > 0.0
        if masked:
            # Rows >= n_rows of the overhanging last block hold undefined
            # VMEM data -> mask them out by global row index.
            row = (jax.lax.broadcasted_iota(jnp.int32, (rows, lanes), 0)
                   + i * tr + row0)
            valid = jnp.logical_and(valid, row < n_rows)
        s = jnp.where(valid, err, 0.0)
        c = jnp.where(valid, 1.0, 0.0)
        s = s.reshape(rows // _SUB, _SUB, lanes).sum(axis=0)
        c = c.reshape(rows // _SUB, _SUB, lanes).sum(axis=0)
        return s, c

    def accumulate(masked):
        zero = jnp.zeros((_SUB, lanes), jnp.float32)

        def body(ci, carry):
            s_acc, c_acc = carry
            row0 = pl.multiple_of(ci * chunk, chunk)
            s, c = chunk_partial(row0, chunk, masked)
            return s_acc + s, c_acc + c

        if n_chunks > 0:
            s_acc, c_acc = jax.lax.fori_loop(0, n_chunks, body, (zero, zero))
        else:
            s_acc, c_acc = zero, zero
        if rem:
            s, c = chunk_partial(n_chunks * chunk, rem, masked)
            s_acc, c_acc = s_acc + s, c_acc + c

        out_ref[0, :, 0:lanes] = s_acc
        out_ref[0, :, lanes:2 * lanes] = c_acc

    if n_rows % tr != 0:
        # Only the last tile overhangs the valid rows; pay the iota mask there only.
        last = pl.num_programs(0) - 1

        @pl.when(i == last)
        def _():
            accumulate(masked=True)

        @pl.when(i != last)
        def _():
            accumulate(masked=False)
    else:
        accumulate(masked=False)


def mae_loss(prediction, gt):
    """Pallas MAE_loss.forward: mean(|prediction - gt|[gt > 0]).

    Returns NaN when no gt element is > 0 (matches torch.mean over an empty
    tensor).
    """
    assert prediction.shape == gt.shape, "prediction and gt must have the same shape"

    n = int(prediction.size)
    pred_flat = prediction.reshape(-1)
    gt_flat = gt.reshape(-1)

    R = n // _LANE
    tail = n - R * _LANE

    if tail:
        # < 128-element tail: pure JAX (negligible) instead of padding both
        # full tensors just for lane alignment.
        p_t = pred_flat[R * _LANE:].astype(jnp.float32)
        g_t = gt_flat[R * _LANE:].astype(jnp.float32)
        t_mask = g_t > 0.0
        tail_sum = jnp.sum(jnp.where(t_mask, jnp.abs(p_t - g_t), 0.0))
        tail_cnt = jnp.sum(t_mask.astype(jnp.float32))
        pred_flat = pred_flat[: R * _LANE]
        gt_flat = gt_flat[: R * _LANE]
    else:
        tail_sum = jnp.float32(0.0)
        tail_cnt = jnp.float32(0.0)

    if R < _SUB:
        # Tiny input (< 1024 elements): pad rows up to one (8, 128) block.
        pad = _SUB * _LANE - R * _LANE
        pred_flat = jnp.pad(pred_flat, (0, pad))
        gt_flat = jnp.pad(gt_flat, (0, pad))     # gt pad = 0 -> masked out
        R = _SUB

    pred2 = pred_flat.reshape(R, _LANE)   # free bitcast (contiguous) under jit
    gt2 = gt_flat.reshape(R, _LANE)

    # Tile height: as large as possible (amortize ~0.35 us/grid step) while
    # keeping >= 2 roughly-even tiles so the parallel axis uses both
    # TensorCores on v7x.  TR is always a multiple of 8; ragged last blocks
    # are masked in-kernel.
    if R <= _SUB:
        TR = R
    else:
        tiles = max(2, _cdiv(R, _TR_CAP))
        TR = min(_TR_CAP, _round_up(_cdiv(R, tiles), _SUB))
    num_tiles = _cdiv(R, TR)

    kernel = functools.partial(_mae_kernel, n_rows=R, chunk=min(_ROW_CHUNK, TR))

    # Inputs are double-buffered by the pipeline; outputs are tiny.  Set the
    # scoped-VMEM limit explicitly so TR=8192 (16 MiB of f32 input buffers)
    # also works on v5e (16 MiB default) and stays under v7x's 64 MiB VMEM.
    in_block_bytes = TR * _LANE * (pred2.dtype.itemsize + gt2.dtype.itemsize)
    vmem_limit = min(2 * in_block_bytes + (4 << 20), 64 << 20)

    bytes_accessed = (n * (prediction.dtype.itemsize + gt.dtype.itemsize)
                      + num_tiles * _SUB * 2 * _LANE * 4)

    out = pl.pallas_call(
        kernel,
        out_shape=jax.ShapeDtypeStruct((num_tiles, _SUB, 2 * _LANE), jnp.float32),
        grid_spec=pltpu.PrefetchScalarGridSpec(
            num_scalar_prefetch=0,
            grid=(num_tiles,),
            in_specs=[
                pl.BlockSpec((TR, _LANE), lambda i: (i, 0)),
                pl.BlockSpec((TR, _LANE), lambda i: (i, 0)),
            ],
            out_specs=pl.BlockSpec((1, _SUB, 2 * _LANE), lambda i: (i, 0, 0)),
        ),
        compiler_params=pltpu.CompilerParams(
            dimension_semantics=("parallel",),
            vmem_limit_bytes=vmem_limit,
        ),
        cost_estimate=pl.CostEstimate(
            flops=6 * n, transcendentals=0, bytes_accessed=bytes_accessed),
    )(pred2, gt2)

    total = jnp.sum(out[:, :, :_LANE]) + tail_sum
    count = jnp.sum(out[:, :, _LANE:]) + tail_cnt
    return total / count


def _reference(prediction, gt):
    """Pure-JAX reference mirroring the PyTorch forward."""
    err = jnp.abs(prediction.astype(jnp.float32) - gt.astype(jnp.float32))
    mask = gt > 0
    return jnp.sum(jnp.where(mask, err, 0.0)) / jnp.sum(mask)


def _run_case(key, shape, scale):
    k1, k2 = jax.random.split(key)
    pred = jax.random.normal(k1, shape, dtype=jnp.float32) * scale
    gt_raw = jax.random.normal(k2, shape, dtype=jnp.float32) * scale
    gt = jnp.where(gt_raw > 0, gt_raw, 0.0)   # zeros = invalid pixels
    loss = jax.block_until_ready(jax.jit(mae_loss)(pred, gt))
    ref = _reference(pred, gt)
    assert jnp.allclose(loss, ref, rtol=1e-5, atol=1e-5), (shape, loss, ref)


if __name__ == "__main__":
    key = jax.random.PRNGKey(0)
    k1, k2, k3 = jax.random.split(key, 3)

    # Test 1: aligned size (n % 128 == 0), two clean tiles, zero extra copies.
    _run_case(k1, (2, 1, 32, 32), 15.0)

    # Test 2: odd size (2*3*13*17 = 1326): <128-element JAX tail + ragged
    # last kernel block exercising the masked pl.when path.
    _run_case(k2, (2, 3, 13, 17), 5.0)

    # Test 3: larger aligned size exercising the chunked fori_loop reduce
    # (2 full 128-row chunks + a 32-row remainder chunk per tile).
    _run_case(k3, (2, 4, 96, 96), 10.0)

    print("KERNEL_OK")
</pallas_src>

<mosaic_0001>
module attributes {stable_mosaic.version = 11 : i64} {
  func.func @_mae_kernel(%arg0: i32, %arg1: memref<8x128xf32, #tpu.memory_space<vmem>>, %arg2: memref<8x128xf32, #tpu.memory_space<vmem>>, %arg3: memref<1x8x256xf32, #tpu.memory_space<vmem>>) attributes {dimension_semantics = [#tpu.dimension_semantics<parallel>], iteration_bounds = array<i64: 2>, scalar_prefetch = 0 : i64, scratch_operands = 0 : i64, tpu.core_type = #tpu.core_type<tc>, window_params = [{transform_indices = @transform_0, window_bounds = array<i64: 8, 128>}, {transform_indices = @transform_1, window_bounds = array<i64: 8, 128>}, {transform_indices = @transform_2, window_bounds = array<i64: 1, 8, 256>}]} {
    %cst = arith.constant 0.000000e+00 : f32
    %0 = vector.broadcast %cst : f32 to vector<8x128xf32>
    %c0_i32 = arith.constant 0 : i32
    %c8_i32 = arith.constant 8 : i32
    %1 = arith.muli %c0_i32, %c8_i32 : i32
    %2 = tpu.assume_multiple %1, 8 : i32
    %3 = arith.index_cast %2 : i32 to index
    %c0 = arith.constant 0 : index
    %4 = vector.load %arg1[%3, %c0] : memref<8x128xf32, #tpu.memory_space<vmem>>, vector<8x128xf32>
    %5 = arith.index_cast %2 : i32 to index
    %c0_0 = arith.constant 0 : index
    %6 = vector.load %arg2[%5, %c0_0] : memref<8x128xf32, #tpu.memory_space<vmem>>, vector<8x128xf32>
    %7 = arith.subf %4, %6 : vector<8x128xf32>
    %8 = math.absf %7 : vector<8x128xf32>
    %cst_1 = arith.constant 0.000000e+00 : f32
    %9 = vector.broadcast %cst_1 : f32 to vector<8x128xf32>
    %10 = arith.cmpf ogt, %6, %9 : vector<8x128xf32>
    %cst_2 = arith.constant 0.000000e+00 : f32
    %11 = vector.broadcast %cst_2 : f32 to vector<8x128xf32>
    %12 = arith.select %10, %8, %11 : vector<8x128xi1>, vector<8x128xf32>
    %cst_3 = arith.constant 1.000000e+00 : f32
    %cst_4 = arith.constant 0.000000e+00 : f32
    %13 = vector.broadcast %cst_3 : f32 to vector<8x128xf32>
    %14 = vector.broadcast %cst_4 : f32 to vector<8x128xf32>
    %15 = arith.select %10, %13, %14 : vector<8x128xi1>, vector<8x128xf32>
    %16 = vector.shape_cast %12 : vector<8x128xf32> to vector<1x8x128xf32>
    %cst_5 = arith.constant dense<0.000000e+00> : vector<8x128xf32>
    %17 = vector.multi_reduction <add>, %16, %cst_5 [0] : vector<1x8x128xf32> to vector<8x128xf32>
    %18 = vector.shape_cast %15 : vector<8x128xf32> to vector<1x8x128xf32>
    %cst_6 = arith.constant dense<0.000000e+00> : vector<8x128xf32>
    %19 = vector.multi_reduction <add>, %18, %cst_6 [0] : vector<1x8x128xf32> to vector<8x128xf32>
    %20 = arith.addf %0, %17 : vector<8x128xf32>
    %21 = arith.addf %0, %19 : vector<8x128xf32>
    %c1_i32 = arith.constant 1 : i32
    %c0_7 = arith.constant 0 : index
    %c0_8 = arith.constant 0 : index
    %c0_9 = arith.constant 0 : index
    %22 = vector.load %arg3[%c0_7, %c0_8, %c0_9] : memref<1x8x256xf32, #tpu.memory_space<vmem>>, vector<1x8x128xf32>
    %23 = vector.shape_cast %22 : vector<1x8x128xf32> to vector<8x128xf32>
    %24 = vector.shape_cast %20 : vector<8x128xf32> to vector<1x8x128xf32>
    tpu.vector_store %arg3[%c0_7, %c0_8, %c0_9], %24 {strides = array<i32>} : memref<1x8x256xf32, #tpu.memory_space<vmem>>, vector<1x8x128xf32>,
    %c0_10 = arith.constant 0 : index
    %c0_11 = arith.constant 0 : index
    %c128 = arith.constant 128 : index
    %25 = vector.load %arg3[%c0_10, %c0_11, %c128] : memref<1x8x256xf32, #tpu.memory_space<vmem>>, vector<1x8x128xf32>
    %26 = vector.shape_cast %25 : vector<1x8x128xf32> to vector<8x128xf32>
    %27 = vector.shape_cast %21 : vector<8x128xf32> to vector<1x8x128xf32>
    tpu.vector_store %arg3[%c0_10, %c0_11, %c128], %27 {strides = array<i32>} : memref<1x8x256xf32, #tpu.memory_space<vmem>>, vector<1x8x128xf32>,
    return
  }
  func.func @transform_0(%arg0: i32) -> (i32, i32) {
    %c0_i32 = arith.constant 0 : i32
    %c0_i32_0 = arith.constant 0 : i32
    return %arg0, %c0_i32 : i32, i32
  }
  func.func @transform_1(%arg0: i32) -> (i32, i32) {
    %c0_i32 = arith.constant 0 : i32
    %c0_i32_0 = arith.constant 0 : i32
    return %arg0, %c0_i32 : i32, i32
  }
  func.func @transform_2(%arg0: i32) -> (i32, i32, i32) {
    %c0_i32 = arith.constant 0 : i32
    %c0_i32_0 = arith.constant 0 : i32
    %c0_i32_1 = arith.constant 0 : i32
    return %arg0, %c0_i32, %c0_i32_0 : i32, i32, i32
  }
}

</mosaic_0001>

<bundles_post_ra>
// kernel: mae_loss.1
= control target key start
LH: loop header
LB: loop body
LE: loop exit
PB: predicated region body
PF: predicated region fallthrough
CT: control target
= control target key end

     0   :  { %s283_s9 = smov 0   ;;  %s297_s0 = inlined_call_operand.vmem [shape: f32[16,128], index: 0, kind: input, shape index: {}]   ;;  %s298_s1 = inlined_call_operand.vmem [shape: f32[16,128], index: 1, kind: input, shape index: {}]   ;;  %s299_s2 = inlined_call_operand.vmem [shape: f32[2,8,256], index: 2, kind: output, shape index: {}]  }
   0x1 LB: > { %s238_s10 = sadd.s32 4294967295, %s265_s9   ;;  %p242_p0 = scmp.ge.s32.totalorder %s265_s9, 1  ;;  %s265_s9 = sphi %s283_s9, %s12_s9  }
   0x2   : > { %p120_p1 = scmp.lt.s32.totalorder %s265_s9, 3 }
   0x4   : > { %p121_p2 = pnand %p242_p0, %p120_p1 }
   0x5   : > { %p145_p3 = scmp.lt.s32.totalorder (!%p121_p2), %s238_s10, 1 }
   0x6   : > { %124 = sbr.rel (%p121_p2) target bundleno = 22 (0x16), region = 28 }
   0xb   : > { %s301_s10 = smov (!%p145_p3, %s238_s10), 1  ;;  %v267_v3 = vmov 0.0  }
   0xc   : > { %s243_s11 = sshll.u32 %s301_s10, 3  ;;  %s249_s12 = sshll.u32 %s301_s10, 4 }
   0xd   : > { %s148_s15 = scalar_lea.vmem %s297_s0, %s243_s11  ;;  %s152_s18 = scalar_lea.vmem %s298_s1, %s243_s11 }
   0xe   : > { %s157_s21 = scalar_lea.vmem %s299_s2, %s249_s12  ;;  %v158_v0 = vld [vmem:[%s148_s15] sm:$0xff] }
   0xf   : > { %v159_v1 = vld [vmem:[%s152_s18] sm:$0xff] }
  0x10   : > { %v160_v2 = vsub.f32 %v158_v0, %v159_v1  ;;  %vm162_vm0 = vcmp.gt.f32.partialorder %v159_v1, 0.0 }
  0x11   : > { %v164_v4 = vsel %vm162_vm0, 1.0, %v267_v3 }
  0x12   : > { %v161_v5 = vand.u32 2147483647, %v160_v2  ;;  %170 = vst [vmem:[%s157_s21 + $0x8] sm:$0xff] %v164_v4 }
  0x14   : > { %v163_v6 = vsel %vm162_vm0, %v161_v5, 0.0 }
  0x15   : > { %169 = vst [vmem:[%s157_s21] sm:$0xff] %v163_v6 }
  0x16 PF: > { %s12_s9 = sadd.s32 1, %s265_s9  }
  0x17   : > { %p9_p4 = scmp.ge.s32.totalorder %s12_s9, 4  }
  0x19   :  { %11 = sbr.rel (!%p9_p4) target bundleno = 1 (0x1), region = 61 }

</bundles_post_ra>
